<compile_context>
chip_gen: v7x
topology: tpu7x:2x2x1
jax: 0.10.0
libtpu: 0.0.40
codegen_flags: <defaults>
</compile_context>

<pallas_src>
import functools

import jax
import jax.numpy as jnp
from jax import lax
from jax.experimental import pallas as pl
from jax.experimental.pallas import tpu as pltpu


# ----------------------------- Pallas kernel ------------------------------- #
def _binconv_pallas(t2d, wmat, bias2d, *, n_kd, nhw, m):
    """out[co, m] = bias[co] + sum_kd wmat[kd] @ t2d[:, kd*nhw : kd*nhw + m]."""
    cout = wmat.shape[1]

    def kernel(t_ref, w_ref, b_ref, o_ref):
        # t_ref: (kH*kW*Cin, Dp*N*Ho*Wo) bf16, values in {-1, 0, +1} (exact)
        # w_ref: (kD, Cout, kH*kW*Cin)   f32
        # b_ref: (Cout, 1)               f32
        # o_ref: (Cout, M)               f32, lane-dense output (M = Do*N*Ho*Wo)
        t = t_ref[...].astype(jnp.float32)          # exact cast of {-1, 0, +1}
        w = w_ref[...]
        acc = jnp.zeros((cout, m), dtype=jnp.float32)
        for kd in range(n_kd):                      # static unroll, kD = 3
            # D-direction im2col: contiguous (and here 128-aligned) lane slice.
            rhs = t[:, kd * nhw: kd * nhw + m]
            acc = acc + jnp.dot(w[kd], rhs, preferred_element_type=jnp.float32)
        o_ref[...] = acc + b_ref[...]               # (Cout, 1) broadcasts over lanes

    return pl.pallas_call(
        kernel,
        out_shape=jax.ShapeDtypeStruct((cout, m), jnp.float32),
        # Gridless call: whole-array VMEM operands, single invocation, no
        # pipelining / double-buffering of grid-invariant weights and bias.
        in_specs=[pl.BlockSpec(memory_space=pltpu.MemorySpace.VMEM)] * 3,
        out_specs=pl.BlockSpec(memory_space=pltpu.MemorySpace.VMEM),
    )(t2d, wmat, bias2d)


# ------------------------------ JAX wrapper -------------------------------- #
def bin_conv3d(x, weight, bias, *, padding, ternary_not_binary=False):
    """BinConv3d forward: BinActive(x) then Conv3d(weight, bias, padding), NCDHW."""
    N, Cin, D, H, W = x.shape
    Cout, Cin_w, kD, kH, kW = weight.shape
    assert Cin == Cin_w
    p = padding
    Do = D + 2 * p - kD + 1
    Ho = H + 2 * p - kH + 1
    Wo = W + 2 * p - kW + 1
    Dp = D + 2 * p

    # BinActive (elementwise on a 16 KiB array; sign(0) = 0 matches PyTorch).
    if ternary_not_binary:
        delta = 0.05 * jnp.max(jnp.abs(x))
        xb = (x > delta).astype(x.dtype) - (x < -delta).astype(x.dtype)
    else:
        xb = jnp.sign(x)
    # {-1, 0, +1} is exact in bf16; halves the only amplified HBM stream.
    xb = xb.astype(jnp.bfloat16)
    xp = jnp.pad(xb, ((0, 0), (0, 0), (p, p), (p, p), (p, p)))

    # H/W unroll (kH*kW = 9x over a ~16 KiB array -> ~90 KiB bf16, one XLA
    # fusion).  Layout: rows (kh, kw, ci); cols (dp, n, oh, ow) with dp
    # lane-major so the kernel's kd taps are contiguous lane slices.
    slabs = [xp[:, :, :, kh:kh + Ho, kw:kw + Wo]
             for kh in range(kH) for kw in range(kW)]
    t = jnp.stack(slabs, axis=0)                    # (kHkW, N, Cin, Dp, Ho, Wo)
    t = jnp.transpose(t, (0, 2, 3, 1, 4, 5))        # (kHkW, Cin, Dp, N, Ho, Wo)
    nhw = N * Ho * Wo
    t2d = t.reshape(kH * kW * Cin, Dp * nhw)        # (36, 1280) at these shapes

    # wmat[kd, co, (kh*kW + kw)*Cin + ci] = weight[co, ci, kd, kh, kw]; ~3.4 KiB.
    wmat = jnp.transpose(weight, (2, 0, 3, 4, 1)).reshape(kD, Cout, kH * kW * Cin)
    wmat = wmat.astype(jnp.float32)
    bias2d = bias.astype(jnp.float32).reshape(Cout, 1)

    m = Do * nhw
    out2d = _binconv_pallas(t2d, wmat, bias2d, n_kd=kD, nhw=nhw, m=m)  # (Cout, M)

    # Cols are ordered (od, n, oh, ow): one tiny 32 KiB reshape + transpose.
    out = out2d.reshape(Cout, Do, N, Ho, Wo)
    return jnp.transpose(out, (2, 0, 1, 3, 4))      # NCDHW (module semantics)


# ------------------------------ reference ---------------------------------- #
def bin_conv3d_ref(x, weight, bias, *, padding):
    xb = jnp.sign(x)
    out = lax.conv_general_dilated(
        xb, weight,
        window_strides=(1, 1, 1),
        padding=[(padding, padding)] * 3,
        dimension_numbers=("NCDHW", "OIDHW", "NCDHW"),
        precision=lax.Precision.HIGHEST,
    )
    return out + bias.reshape(1, -1, 1, 1, 1)


# --------------------------------- main ------------------------------------ #
if __name__ == "__main__":
    # BinConv3d(in_channels=4, out_channels=8, kernel_size=3, padding=1)
    N, Cin, D, H, W = 2, 4, 8, 8, 8
    Cout, k, pad = 8, 3, 1

    key = jax.random.PRNGKey(0)
    kx, kw_, kb = jax.random.split(key, 3)
    x = jax.random.normal(kx, (N, Cin, D, H, W), dtype=jnp.float32)
    fan_in = Cin * k * k * k
    bound = 1.0 / (fan_in ** 0.5)
    weight = jax.random.uniform(kw_, (Cout, Cin, k, k, k),
                                minval=-bound, maxval=bound, dtype=jnp.float32)
    bias = jax.random.uniform(kb, (Cout,), minval=-bound, maxval=bound,
                              dtype=jnp.float32)

    fwd = jax.jit(functools.partial(bin_conv3d, padding=pad))
    out = jax.block_until_ready(fwd(x, weight, bias))
    ref = jax.block_until_ready(bin_conv3d_ref(x, weight, bias, padding=pad))

    assert out.shape == (N, Cout, D, H, W), out.shape
    assert jnp.allclose(out, ref, atol=1e-4, rtol=1e-4), float(
        jnp.max(jnp.abs(out - ref)))

    print("KERNEL_OK")
</pallas_src>

<mosaic_0001>
module attributes {stable_mosaic.version = 11 : i64} {
  func.func @kernel(%arg0: memref<36x1280xbf16, #tpu.memory_space<vmem>>, %arg1: memref<3x8x36xf32, #tpu.memory_space<vmem>>, %arg2: memref<8x1xf32, #tpu.memory_space<vmem>>, %arg3: memref<8x1024xf32, #tpu.memory_space<vmem>>) attributes {dimension_semantics = [], scalar_prefetch = 0 : i64, scratch_operands = 0 : i64, tpu.core_type = #tpu.core_type<tc>} {
    %c0 = arith.constant 0 : index
    %c0_0 = arith.constant 0 : index
    %0 = vector.load %arg0[%c0, %c0_0] : memref<36x1280xbf16, #tpu.memory_space<vmem>>, vector<36x1280xbf16>
    %1 = arith.extf %0 : vector<36x1280xbf16> to vector<36x1280xf32>
    %c0_1 = arith.constant 0 : index
    %c0_2 = arith.constant 0 : index
    %c0_3 = arith.constant 0 : index
    %2 = vector.load %arg1[%c0_1, %c0_2, %c0_3] : memref<3x8x36xf32, #tpu.memory_space<vmem>>, vector<3x8x36xf32>
    %cst = arith.constant 0.000000e+00 : f32
    %3 = vector.broadcast %cst : f32 to vector<8x1024xf32>
    %4 = vector.extract_strided_slice %1 {offsets = [0, 0], sizes = [36, 1024], strides = [1, 1]} : vector<36x1280xf32> to vector<36x1024xf32>
    %5 = vector.extract_strided_slice %2 {offsets = [0, 0, 0], sizes = [1, 8, 36], strides = [1, 1, 1]} : vector<3x8x36xf32> to vector<1x8x36xf32>
    %6 = vector.shape_cast %5 : vector<1x8x36xf32> to vector<8x36xf32>
    %cst_4 = arith.constant dense<0.000000e+00> : vector<8x1024xf32>
    %7 = tpu.matmul %6, %4, %cst_4 {dimension_numbers = #tpu.dot_dimension_numbers<[1], [0], [0], [1], [0, 0, 1, 1], [], []>} : vector<8x36xf32>, vector<36x1024xf32>, vector<8x1024xf32> -> vector<8x1024xf32>
    %8 = arith.addf %3, %7 : vector<8x1024xf32>
    %9 = vector.extract_strided_slice %1 {offsets = [0, 128], sizes = [36, 1024], strides = [1, 1]} : vector<36x1280xf32> to vector<36x1024xf32>
    %10 = vector.extract_strided_slice %2 {offsets = [1, 0, 0], sizes = [1, 8, 36], strides = [1, 1, 1]} : vector<3x8x36xf32> to vector<1x8x36xf32>
    %11 = vector.shape_cast %10 : vector<1x8x36xf32> to vector<8x36xf32>
    %cst_5 = arith.constant dense<0.000000e+00> : vector<8x1024xf32>
    %12 = tpu.matmul %11, %9, %cst_5 {dimension_numbers = #tpu.dot_dimension_numbers<[1], [0], [0], [1], [0, 0, 1, 1], [], []>} : vector<8x36xf32>, vector<36x1024xf32>, vector<8x1024xf32> -> vector<8x1024xf32>
    %13 = arith.addf %8, %12 : vector<8x1024xf32>
    %14 = vector.extract_strided_slice %1 {offsets = [0, 256], sizes = [36, 1024], strides = [1, 1]} : vector<36x1280xf32> to vector<36x1024xf32>
    %15 = vector.extract_strided_slice %2 {offsets = [2, 0, 0], sizes = [1, 8, 36], strides = [1, 1, 1]} : vector<3x8x36xf32> to vector<1x8x36xf32>
    %16 = vector.shape_cast %15 : vector<1x8x36xf32> to vector<8x36xf32>
    %cst_6 = arith.constant dense<0.000000e+00> : vector<8x1024xf32>
    %17 = tpu.matmul %16, %14, %cst_6 {dimension_numbers = #tpu.dot_dimension_numbers<[1], [0], [0], [1], [0, 0, 1, 1], [], []>} : vector<8x36xf32>, vector<36x1024xf32>, vector<8x1024xf32> -> vector<8x1024xf32>
    %18 = arith.addf %13, %17 : vector<8x1024xf32>
    %c0_7 = arith.constant 0 : index
    %c0_8 = arith.constant 0 : index
    %19 = vector.load %arg2[%c0_7, %c0_8] : memref<8x1xf32, #tpu.memory_space<vmem>>, vector<8x1xf32>
    %20 = vector.broadcast %19 : vector<8x1xf32> to vector<8x1024xf32>
    %21 = arith.addf %18, %20 : vector<8x1024xf32>
    %c0_9 = arith.constant 0 : index
    %c0_10 = arith.constant 0 : index
    %22 = vector.load %arg3[%c0_9, %c0_10] : memref<8x1024xf32, #tpu.memory_space<vmem>>, vector<8x1024xf32>
    tpu.vector_store %arg3[%c0_9, %c0_10], %21 {strides = array<i32>} : memref<8x1024xf32, #tpu.memory_space<vmem>>, vector<8x1024xf32>,
    return
  }
}

</mosaic_0001>

<bundles_post_ra>
// kernel: bin_conv3d.1
= control target key start
LH: loop header
LB: loop body
LE: loop exit
PB: predicated region body
PF: predicated region fallthrough
CT: control target
= control target key end

     0   :  { %v1248_v1 = vmov 0.0   ;;  %v1249_v3 = vmov 0   ;;  %vm96_vm0 = vcmask 1043456   ;;  %vm92_vm1 = vcmask 293888   ;;  %s1529_s0 = inlined_call_operand.vmem [shape: bf16[36,1280], index: 0, kind: input, shape index: {}]   ;;  %s1530_s1 = inlined_call_operand.vmem [shape: f32[3,8,36], index: 1, kind: input, shape index: {}]   ;;  %s1531_s2 = inlined_call_operand.vmem [shape: f32[8,1], index: 2, kind: input, shape index: {}]   ;;  %s1532_s3 = inlined_call_operand.vmem [shape: f32[8,1024], index: 3, kind: output, shape index: {}]  }
   0x1   :  { %v1273_v0 = vld [vmem:[%s1529_s0 + $0x8] ss:$40 sps:$4 sm:$0xff]   ;;  %185 = vmatprep.mubr.f32.mxu0 %v1248_v1  ;;  %256 = vmatprep.mubr.f32.mxu1 %v1248_v1  ;;  %v1223_v4 = vld [vmem:[%s1529_s0 + $0x4] ss:$40 sps:$4 sm:$0xff]   ;;  %v1295_v6 = vld [vmem:[%s1529_s0 + $0x58] ss:$40 sps:$4 sm:$0xff]  }
   0x2   :  { %v1280_v2 = vld [vmem:[%s1529_s0 + $0x10] ss:$40 sps:$4 sm:$0xff]   ;;  %1217 = vset.pattern.permute.xlu0 %v1249_v3  ;;  %1056 = vmatprep.subr.bf16.mxu0 %v1273_v0  ;;  %v1290_v5 = vld [vmem:[%s1529_s0 + $0xc] ss:$40 sps:$4 sm:$0xff]   ;;  %v1301_v7 = vld [vmem:[%s1529_s0 + $0x60] ss:$40 sps:$4 sm:$0xff]  }
   0x3   :  { %1064 = vmatprep.subr.bf16.mxu1 %v1280_v2  ;;  %1058 = vmatpush1.bf16.msra.mxu0 %v1223_v4  ;;  %v1232_v8 = vld [vmem:[%s1529_s0 + $0x54] ss:$40 sps:$4 sm:$0xff]   ;;  %v35_v10 = vld [vmem:[%s1529_s0 + $0xa8] sm:$0x33]  ;;  %v1322_v12 = vld [vmem:[%s1529_s0 + $0xa0] sm:$0x33] }
   0x4   :  { %1066 = vmatpush1.bf16.msra.mxu1 %v1290_v5  ;;  %1060 = vmatprep.subr.bf16.mxu0 %v1295_v6  ;;  %v1311_v9 = vld [vmem:[%s1529_s0 + $0x5c] ss:$40 sps:$4 sm:$0xff]   ;;  %v36_v11 = vld [vmem:[%s1529_s0 + $0xb0] sm:$0x33]  ;;  %v1325_v13 = vunpack.c.l.bf16 %v35_v10  ;;  %v80_v16 = vunpack.c.h.bf16 %v1322_v12  ;;  %v1335_v17 = vunpack.c.h.bf16 %v35_v10  ;;  %v1340_v18 = vld [vmem:[%s1529_s0 + $0x18] ss:$40 sps:$4 sm:$0xff]   ;;  %v79_v35 = vunpack.c.l.bf16 %v1322_v12 }
   0x5   :  { %1068 = vmatprep.subr.bf16.mxu1 %v1301_v7  ;;  %v1327_v14 = vunpack.c.l.bf16 %v36_v11  ;;  %v1332_v15 = vld [vmem:[%s1529_s0 + $0x14] ss:$40 sps:$4 sm:$0xff]   ;;  %v1354_v20 = vld [vmem:[%s1529_s0 + $0x20] ss:$40 sps:$4 sm:$0xff]   ;;  %v1370_v23 = vld [vmem:[%s1529_s0 + $0x70] ss:$40 sps:$4 sm:$0xff]   ;;  %v84_v31 = vunpack.c.h.bf16 %v36_v11 }
   0x6   :  { %v1349_v19 = vld [vmem:[%s1529_s0 + $0x1c] ss:$40 sps:$4 sm:$0xff]   ;;  %v90_v21 = vld [vmem:[%s1530_s1 + $0x8] sm:$0xff]  ;;  %v1234_v34 = vld [vmem:[%s1529_s0 + $0x50] ss:$40 sps:$4 sm:$0xff]  }
   0x7   :  { %1062 = vmatpush1.bf16.msra.mxu0 %v1232_v8  ;;  %v1362_v22 = vld [vmem:[%s1529_s0 + $0x68] ss:$40 sps:$4 sm:$0xff]   ;;  %v37_v24 = vld [vmem:[%s1529_s0 + $0xb8] sm:$0x33]  ;;  %v1380_v25 = vld [vmem:[%s1529_s0 + $0xc0] sm:$0x33] }
   0x8   :  { %1070 = vmatpush1.bf16.msra.mxu1 %v1311_v9  ;;  %1019 = vmatprep.subr.msk.mxu0 %vm96_vm0, %v1325_v13  ;;  %v1231_v26 = vld [vmem:[%s1529_s0 + $0x64] ss:$40 sps:$4 sm:$0xff]   ;;  %v1399_v29 = vunpack.c.l.bf16 %v37_v24  ;;  %v87_v30 = vunpack.c.l.bf16 %v1380_v25  ;;  %v1405_v32 = vunpack.c.h.bf16 %v37_v24  ;;  %v1225_v33 = vld [vmem:[%s1529_s0] ss:$40 sps:$4 sm:$0xff]   ;;  %v91_v37 = vld [vmem:[%s1530_s1 + $0x10] sm:$0xff]  ;;  %v88_v40 = vunpack.c.h.bf16 %v1380_v25 }
   0x9   :  { %1022 = vmatprep.subr.msk.mxu1 %vm96_vm0, %v1327_v14  ;;  %v1392_v27 = vld [vmem:[%s1529_s0 + $0x6c] ss:$40 sps:$4 sm:$0xff]   ;;  %v993_v28 = vld [vmem:[%s1531_s2] sm:$0xff] }
   0xa   :  { %996 = vperm.xlu0 %1217, %v993_v28   ;;  %v89_v36 = vld [vmem:[%s1530_s1] sm:$0xff]  ;;  %v1247_v39 = vld [vmem:[%s1529_s0 + $0x74] ss:$40 sps:$4 sm:$0xff]  }
   0xb   :  { %1020 = vmatpush1.msk.msra.mxu0 %vm96_vm0, %v80_v16  ;;  %v1246_v38 = vld [vmem:[%s1529_s0 + $0x24] ss:$40 sps:$4 sm:$0xff]  }
   0xc   :  { %1023 = vmatpush1.msk.msra.mxu1 %vm96_vm0, %v1335_v17  ;;  %1072 = vmatprep.subr.bf16.mxu0 %v1340_v18 }
   0xd   :  { %1080 = vmatprep.subr.bf16.mxu1 %v1354_v20  ;;  %1021 = vmatmul.mubr.msk.f32.vlgmr.msra.gmra.mrb[0].mxu0 %vm92_vm1, %v90_v21 }
   0xe   :  { %1024 = vmatmul.mubr.msk.f32.vlgmr.msra.gmra.mrb[0].mxu1 %vm92_vm1, %v90_v21  ;;  %1074 = vmatpush1.bf16.msra.mxu0 %v1332_v15 }
   0xf   :  { %1082 = vmatpush1.bf16.msra.mxu1 %v1349_v19  ;;  %1076 = vmatprep.subr.bf16.mxu0 %v1362_v22 }
  0x10   :  { %1084 = vmatprep.subr.bf16.mxu1 %v1370_v23  ;;  %327 = vmatprep.mubr.f32.mxu0 %v1248_v1 }
  0x11   :  { %398 = vmatprep.mubr.f32.mxu1 %v1248_v1 }
  0x12   :  { %1078 = vmatpush1.bf16.msra.mxu0 %v1231_v26 }
  0x13   :  { %1086 = vmatpush1.bf16.msra.mxu1 %v1392_v27  ;;  %1025 = vmatprep.subr.msk.mxu0 %vm96_vm0, %v1399_v29 }
  0x14   :  { %1028 = vmatprep.subr.msk.mxu1 %vm96_vm0, %v87_v30 }
  0x16   :  { %1026 = vmatpush1.msk.msra.mxu0 %vm96_vm0, %v84_v31 }
  0x17   :  { %1029 = vmatpush1.msk.msra.mxu1 %vm96_vm0, %v1405_v32  ;;  %1088 = vmatprep.subr.bf16.mxu0 %v1223_v4 }
  0x18   :  { %1096 = vmatprep.subr.bf16.mxu1 %v1290_v5  ;;  %1027 = vmatmul.mubr.msk.f32.vlgmr.msra.gmra.mrb[2].mxu0 %vm92_vm1, %v90_v21 }
  0x19   :  { %1030 = vmatmul.mubr.msk.f32.vlgmr.msra.gmra.mrb[2].mxu1 %vm92_vm1, %v90_v21  ;;  %1090 = vmatpush1.bf16.msra.mxu0 %v1225_v33 }
  0x1a   :  { %1098 = vmatpush1.bf16.msra.mxu1 %v1273_v0  ;;  %1092 = vmatprep.subr.bf16.mxu0 %v1232_v8 }
  0x1b   :  { %1100 = vmatprep.subr.bf16.mxu1 %v1311_v9  ;;  %475 = vmatprep.mubr.f32.mxu0 %v1248_v1 }
  0x1c   :  { %546 = vmatprep.mubr.f32.mxu1 %v1248_v1 }
  0x1d   :  { %1094 = vmatpush1.bf16.msra.mxu0 %v1234_v34 }
  0x1e   :  { %1102 = vmatpush1.bf16.msra.mxu1 %v1295_v6  ;;  %1031 = vmatprep.subr.msk.mxu0 %vm96_vm0, %v80_v16 }
  0x1f   :  { %1034 = vmatprep.subr.msk.mxu1 %vm96_vm0, %v1335_v17 }
  0x21   :  { %1032 = vmatpush1.msk.msra.mxu0 %vm96_vm0, %v79_v35 }
  0x22   :  { %1035 = vmatpush1.msk.msra.mxu1 %vm96_vm0, %v1325_v13  ;;  %1104 = vmatprep.subr.bf16.mxu0 %v1332_v15 }
  0x23   :  { %1112 = vmatprep.subr.bf16.mxu1 %v1349_v19  ;;  %1033 = vmatmul.mubr.msk.f32.vlgmr.msra.gmra.mrb[0].mxu0 %vm92_vm1, %v89_v36 }
  0x24   :  { %1036 = vmatmul.mubr.msk.f32.vlgmr.msra.gmra.mrb[0].mxu1 %vm92_vm1, %v89_v36  ;;  %1106 = vmatpush1.bf16.msra.mxu0 %v1280_v2 }
  0x25   :  { %1114 = vmatpush1.bf16.msra.mxu1 %v1340_v18  ;;  %1108 = vmatprep.subr.bf16.mxu0 %v1231_v26 }
  0x26   :  { %1116 = vmatprep.subr.bf16.mxu1 %v1392_v27  ;;  %617 = vmatprep.mubr.f32.mxu0 %v1248_v1 }
  0x27   :  { %688 = vmatprep.mubr.f32.mxu1 %v1248_v1 }
  0x28   :  { %1110 = vmatpush1.bf16.msra.mxu0 %v1301_v7 }
  0x29   :  { %1118 = vmatpush1.bf16.msra.mxu1 %v1362_v22  ;;  %1037 = vmatprep.subr.msk.mxu0 %vm96_vm0, %v84_v31 }
  0x2a   :  { %1040 = vmatprep.subr.msk.mxu1 %vm96_vm0, %v1405_v32 }
  0x2c   :  { %1038 = vmatpush1.msk.msra.mxu0 %vm96_vm0, %v1327_v14 }
  0x2d   :  { %1041 = vmatpush1.msk.msra.mxu1 %vm96_vm0, %v1399_v29  ;;  %1120 = vmatprep.subr.bf16.mxu0 %v1290_v5 }
  0x2e   :  { %1128 = vmatprep.subr.bf16.mxu1 %v1332_v15  ;;  %1039 = vmatmul.mubr.msk.f32.vlgmr.msra.gmra.mrb[2].mxu0 %vm92_vm1, %v89_v36 }
  0x2f   :  { %1042 = vmatmul.mubr.msk.f32.vlgmr.msra.gmra.mrb[2].mxu1 %vm92_vm1, %v89_v36  ;;  %1122 = vmatpush1.bf16.msra.mxu0 %v1273_v0 }
  0x30   :  { %1130 = vmatpush1.bf16.msra.mxu1 %v1280_v2  ;;  %1124 = vmatprep.subr.bf16.mxu0 %v1311_v9 }
  0x31   :  { %1132 = vmatprep.subr.bf16.mxu1 %v1231_v26  ;;  %765 = vmatprep.mubr.f32.mxu0 %v1248_v1 }
  0x32   :  { %836 = vmatprep.mubr.f32.mxu1 %v1248_v1 }
  0x33   :  { %1126 = vmatpush1.bf16.msra.mxu0 %v1295_v6 }
  0x34   :  { %1134 = vmatpush1.bf16.msra.mxu1 %v1301_v7  ;;  %1043 = vmatprep.subr.msk.mxu0 %vm96_vm0, %v1335_v17 }
  0x35   :  { %1046 = vmatprep.subr.msk.mxu1 %vm96_vm0, %v84_v31 }
  0x37   :  { %1044 = vmatpush1.msk.msra.mxu0 %vm96_vm0, %v1325_v13 }
  0x38   :  { %1047 = vmatpush1.msk.msra.mxu1 %vm96_vm0, %v1327_v14  ;;  %1045 = vmatmul.mubr.msk.f32.vlgmr.msra.gmra.mrb[0].mxu0 %vm92_vm1, %v91_v37 }
  0x39   :  { %1048 = vmatmul.mubr.msk.f32.vlgmr.msra.gmra.mrb[0].mxu1 %vm92_vm1, %v91_v37  ;;  %1136 = vmatprep.subr.bf16.mxu0 %v1349_v19 }
  0x3a   :  { %1144 = vmatprep.subr.bf16.mxu1 %v1246_v38  ;;  %1138 = vmatpush1.bf16.msra.mxu0 %v1340_v18 }
  0x3b   :  { %1146 = vmatpush1.bf16.msra.mxu1 %v1354_v20  ;;  %1140 = vmatprep.subr.bf16.mxu0 %v1392_v27 }
  0x3c   :  { %1148 = vmatprep.subr.bf16.mxu1 %v1247_v39  ;;  %907 = vmatprep.mubr.f32.mxu0 %v1248_v1 }
  0x3d   :  { %978 = vmatprep.mubr.f32.mxu1 %v1248_v1 }
  0x3e   :  { %1142 = vmatpush1.bf16.msra.mxu0 %v1362_v22 }
  0x3f   :  { %1150 = vmatpush1.bf16.msra.mxu1 %v1370_v23  ;;  %1049 = vmatprep.subr.msk.mxu0 %vm96_vm0, %v1405_v32 }
  0x40   :  { %1052 = vmatprep.subr.msk.mxu1 %vm96_vm0, %v88_v40 }
  0x42   :  { %1050 = vmatpush1.msk.msra.mxu0 %vm96_vm0, %v1399_v29 }
  0x43   :  { %1053 = vmatpush1.msk.msra.mxu1 %vm96_vm0, %v87_v30  ;;  %1051 = vmatmul.mubr.msk.f32.vlgmr.msra.gmra.mrb[2].mxu0 %vm92_vm1, %v91_v37 }
  0x44   :  { %1054 = vmatmul.mubr.msk.f32.vlgmr.msra.gmra.mrb[2].mxu1 %vm92_vm1, %v91_v37 }
  0x89   :  { %v997_v41 = vpop.permute.xlu0 %996 }
 0x10b   :  { %v767_v42 = vpop.f32.mrb[0].mxu0 }
 0x10c   :  { %v838_v43 = vpop.f32.mrb[0].mxu1  ;;  %v999_v44 = vadd.f32 %v997_v41, %v767_v42  ;;  %v769_v46 = vpop.f32.mrb[1].mxu0 }
 0x10d   :  { %v1001_v45 = vadd.f32 %v997_v41, %v838_v43  ;;  %v840_v47 = vpop.f32.mrb[1].mxu1  ;;  %v1000_v48 = vadd.f32 %v997_v41, %v769_v46 }
 0x10e   :  { %v1002_v49 = vadd.f32 %v997_v41, %v840_v47  ;;  %1007 = vst [vmem:[%s1532_s3] sm:$0xff] %v999_v44 }
 0x10f   :  { %1009 = vst [vmem:[%s1532_s3 + $0x10] sm:$0xff] %v1001_v45  ;;  %1008 = vst [vmem:[%s1532_s3 + $0x8] sm:$0xff] %v1000_v48 }
 0x110   :  { %1010 = vst [vmem:[%s1532_s3 + $0x18] sm:$0xff] %v1002_v49 }
 0x116   :  { %v909_v50 = vpop.f32.mrb[2].mxu0 }
 0x117   :  { %v980_v51 = vpop.f32.mrb[2].mxu1  ;;  %v1003_v52 = vadd.f32 %v997_v41, %v909_v50  ;;  %v911_v54 = vpop.f32.mrb[3].mxu0 }
 0x118   :  { %v1005_v53 = vadd.f32 %v997_v41, %v980_v51  ;;  %v982_v55 = vpop.f32.mrb[3].mxu1  ;;  %v1004_v56 = vadd.f32 %v997_v41, %v911_v54 }
 0x119   :  { %v1006_v57 = vadd.f32 %v997_v41, %v982_v55  ;;  %1011 = vst [vmem:[%s1532_s3 + $0x20] sm:$0xff] %v1003_v52 }
 0x11a   :  { %1013 = vst [vmem:[%s1532_s3 + $0x30] sm:$0xff] %v1005_v53  ;;  %1012 = vst [vmem:[%s1532_s3 + $0x28] sm:$0xff] %v1004_v56 }
 0x11b   :  { %1014 = vst [vmem:[%s1532_s3 + $0x38] sm:$0xff] %v1006_v57 }

</bundles_post_ra>
